<compile_context>
chip_gen: v7x
topology: tpu7x:2x2x1
jax: 0.10.0
libtpu: 0.0.40
codegen_flags: <defaults>
</compile_context>

<pallas_src>
import functools

import jax
import jax.numpy as jnp
from jax import lax
from jax.experimental import pallas as pl
from jax.experimental.pallas import tpu as pltpu


def _round_up(x, m):
    return ((x + m - 1) // m) * m


def _cdiv(a, b):
    return (a + b - 1) // b


def _text_adapter_kernel(scale_ref, x_ref, off_ref, o_ref, *,
                         tp, pm1, need_mask, single_step, transposed):
    """One grid step: sum a TP-chunk of prompt templates for one class tile.

    scale_ref : SMEM (1,) f32            -- alpha / (P-1)
    x_ref     : VMEM (tp, tc, D)         -- chunk of x_text
    off_ref   : VMEM (D, tc) or (tc, D)  -- llm_prompt*(1-alpha) + bias
    o_ref     : VMEM (D, tc) or (tc, D)  -- output; doubles as the f32
                 accumulator (its block index is invariant over the p axis).
    """
    p = pl.program_id(1)

    x = x_ref[...].astype(jnp.float32)                      # (tp, tc, D)
    if need_mask:
        # Ragged last prompt chunk: zero rows >= P-1 so neither template P-1
        # nor out-of-bounds rows are counted.  Sublane iota -> cheap VPU mask.
        row = lax.broadcasted_iota(jnp.int32, (tp, x.shape[1]), 0)
        x = jnp.where(((p * tp + row) < pm1)[:, :, None], x, 0.0)

    s = jnp.sum(x, axis=0)                                  # (tc, D) partial sum
    if transposed:
        s = s.T                                             # (D, tc) on the XLU (free slot)
    feat_axis = 0 if transposed else 1

    def _finalize(acc):
        # mean * alpha folded into one multiply: sum * (alpha / (P-1)).
        y = acc * scale_ref[0] + off_ref[...]
        ssq = jnp.sum(y * y, axis=feat_axis, keepdims=True)
        # rsqrt -> EUP slot; eps guard keeps padded class rows finite.
        o_ref[...] = (y * lax.rsqrt(jnp.maximum(ssq, 1e-30))).astype(o_ref.dtype)

    if single_step:                                         # TP == P-1: no reduction axis
        _finalize(s)
    else:
        @pl.when(p == 0)
        def _():
            o_ref[...] = s

        @pl.when(p > 0)
        def _():
            o_ref[...] += s

        @pl.when(p == pl.num_programs(1) - 1)
        def _():
            _finalize(o_ref[...])


def text_adapter_forward(x_text, llm_prompt, bias, alpha, *, tp=None):
    """x_text: (P, C, D) f32/bf16, llm_prompt/bias: (C, D) -> (D, C) float32."""
    P, C, D = x_text.shape
    if P < 2:
        raise ValueError("TextAdapter needs at least 2 prompt templates (P >= 2).")
    pm1 = P - 1
    in_bytes = jnp.dtype(x_text.dtype).itemsize

    # ---- tiling -------------------------------------------------------------
    budget = 24 * 1024 * 1024          # VMEM data budget (safe on v5e/v6e/v7x)
    c_pad = _round_up(C, 128)          # only the small (C,D)/(D,C) tensors get padded
    n128 = c_pad // 128
    k = min(4, n128)                                   # class tile <= 512 lanes
    if n128 >= 2 and _cdiv(n128, k) < 2:               # >=2 class tiles so both
        k = max(1, n128 // 2)                          #   v7x TensorCores get work
    while k > 1 and 16 * 128 * k * D > budget // 2:    # offset+out, double-buffered f32
        k -= 1
    tc = 128 * k
    grid_c = _cdiv(c_pad, tc)

    # Prompt-axis chunk: TP = P-1 when it fits (reduction axis collapses to one
    # step); otherwise chunk and mask the ragged tail in-kernel.
    fixed = 16 * tc * D                                # offset + output (f32, x2 buffers)
    per_tp = 2 * tc * D * in_bytes                     # double-buffered x chunk
    tp_budget = max(1, (budget - fixed) // per_tp)
    tp = min(pm1, tp_budget) if tp is None else max(1, min(pm1, int(tp)))
    grid_p = _cdiv(pm1, tp)
    need_mask = (pm1 % tp) != 0
    single_step = grid_p == 1

    # ---- tiny (C, D) precompute: one fused XLA op, no pass over x_text ------
    alpha = jnp.asarray(alpha, jnp.float32)
    offset = (llm_prompt.astype(jnp.float32) * (1.0 - alpha)
              + bias.astype(jnp.float32))                       # (C, D)
    scale = jnp.reshape(alpha / pm1, (1,))                      # SMEM scalar

    transposed = (D % 128 == 0)        # lane-dense (D, C) stores straight from the kernel
    if transposed:
        offset = jnp.pad(offset.T, ((0, 0), (0, c_pad - C)))    # (D, c_pad)
        io_block, io_map = (D, tc), (lambda c, p: (0, c))
        out_shape = (D, c_pad)
    else:
        # TODO(synk): D not 128-aligned -> keep (C, D) layout in the kernel and
        # transpose the small output in the wrapper instead of on the XLU.
        offset = jnp.pad(offset, ((0, c_pad - C), (0, 0)))      # (c_pad, D)
        io_block, io_map = (tc, D), (lambda c, p: (c, 0))
        out_shape = (c_pad, D)

    kernel = functools.partial(
        _text_adapter_kernel, tp=tp, pm1=pm1, need_mask=need_mask,
        single_step=single_step, transposed=transposed)

    out = pl.pallas_call(
        kernel,
        out_shape=jax.ShapeDtypeStruct(out_shape, jnp.float32),
        grid=(grid_c, grid_p),
        in_specs=[
            pl.BlockSpec(memory_space=pltpu.MemorySpace.SMEM),   # alpha/(P-1)
            # Full x_text passed through: the p axis only ever covers the first
            # P-1 templates, so x_text[-1] is never DMA'd and no wrapper-side
            # slice/pad copy of the big tensor is materialized.
            pl.BlockSpec((tp, tc, D), lambda c, p: (p, c, 0)),
            pl.BlockSpec(io_block, io_map),
        ],
        out_specs=pl.BlockSpec(io_block, io_map),
        compiler_params=pltpu.CompilerParams(
            dimension_semantics=("parallel", "arbitrary"),
            vmem_limit_bytes=40 * 1024 * 1024,
        ),
    )(scale, x_text, offset)

    return out[:, :C] if transposed else out[:C].T


def text_adapter_reference(x_text, llm_prompt, bias, alpha):
    x = jnp.mean(x_text[:-1].astype(jnp.float32), axis=0)
    x = x * alpha + llm_prompt * (1.0 - alpha)
    x = x + bias
    x = x / jnp.linalg.norm(x, axis=-1, keepdims=True)
    return x.T


if __name__ == "__main__":
    key = jax.random.PRNGKey(0)

    def run_case(P, C, D, alpha, tp=None):
        k1, k2, k3 = jax.random.split(jax.random.fold_in(key, P * 1000 + C * 10 + D), 3)
        clip_weights = jax.random.normal(k1, (P, C, D), dtype=jnp.float32)
        llm_prompt = clip_weights[-1]                         # (C, D) frozen param
        bias = 0.1 * jax.random.normal(k3, (C, D), dtype=jnp.float32)
        x_text = jax.random.normal(k2, (P, C, D), dtype=jnp.float32)

        out = jax.block_until_ready(
            text_adapter_forward(x_text, llm_prompt, bias, alpha, tp=tp))
        ref = text_adapter_reference(x_text, llm_prompt, bias, alpha)
        assert out.shape == (D, C), (out.shape, (D, C))
        assert jnp.allclose(out, ref, atol=1e-5, rtol=1e-5), "mismatch vs reference"

    # 1) lane-dense in-kernel transpose path (single prompt step)
    run_case(8, 16, 128, 0.6)
    # 2) chunked prompt axis with ragged-chunk mask + accumulation in the output
    run_case(8, 16, 128, 0.6, tp=3)
    # 3) D not 128-aligned -> safe (C, D) + wrapper-transpose fallback
    run_case(5, 10, 32, 0.25)

    print("KERNEL_OK")
</pallas_src>

<mosaic_0001>
module attributes {stable_mosaic.version = 11 : i64} {
  func.func @_text_adapter_kernel(%arg0: i32, %arg1: i32, %arg2: memref<1xf32, #tpu.memory_space<smem>>, %arg3: memref<7x128x128xf32, #tpu.memory_space<vmem>>, %arg4: memref<128x128xf32, #tpu.memory_space<vmem>>, %arg5: memref<128x128xf32, #tpu.memory_space<vmem>>) attributes {dimension_semantics = [#tpu.dimension_semantics<parallel>, #tpu.dimension_semantics<arbitrary>], iteration_bounds = array<i64: 1, 1>, scalar_prefetch = 0 : i64, scratch_operands = 0 : i64, tpu.core_type = #tpu.core_type<tc>, window_params = [{transform_indices = @transform_0, window_bounds = array<i64: 1>}, {transform_indices = @transform_1, window_bounds = array<i64: 7, 128, 128>}, {transform_indices = @transform_2, window_bounds = array<i64: 128, 128>}, {transform_indices = @transform_3, window_bounds = array<i64: 128, 128>}]} {
    %c0 = arith.constant 0 : index
    %c0_0 = arith.constant 0 : index
    %c0_1 = arith.constant 0 : index
    %0 = vector.load %arg3[%c0, %c0_0, %c0_1] : memref<7x128x128xf32, #tpu.memory_space<vmem>>, vector<7x128x128xf32>
    %cst = arith.constant dense<0.000000e+00> : vector<128x128xf32>
    %1 = vector.multi_reduction <add>, %0, %cst [0] : vector<7x128x128xf32> to vector<128x128xf32>
    %2 = tpu.transpose %1, [1, 0] : vector<128x128xf32> -> vector<128x128xf32>
    %c0_2 = arith.constant 0 : index
    %3 = memref.load %arg2[%c0_2] : memref<1xf32, #tpu.memory_space<smem>>
    %4 = vector.broadcast %3 : f32 to vector<128x128xf32>
    %5 = arith.mulf %2, %4 : vector<128x128xf32>
    %c0_3 = arith.constant 0 : index
    %c0_4 = arith.constant 0 : index
    %6 = vector.load %arg4[%c0_3, %c0_4] : memref<128x128xf32, #tpu.memory_space<vmem>>, vector<128x128xf32>
    %7 = arith.addf %5, %6 : vector<128x128xf32>
    %8 = arith.mulf %7, %7 : vector<128x128xf32>
    %cst_5 = arith.constant dense<0.000000e+00> : vector<128xf32>
    %9 = vector.multi_reduction <add>, %8, %cst_5 [0] : vector<128x128xf32> to vector<128xf32>
    %10 = vector.shape_cast %9 : vector<128xf32> to vector<1x128xf32>
    %cst_6 = arith.constant 1.000000e-30 : f32
    %11 = vector.broadcast %cst_6 : f32 to vector<1x128xf32>
    %12 = arith.maximumf %10, %11 : vector<1x128xf32>
    %13 = math.rsqrt %12 : vector<1x128xf32>
    %14 = vector.broadcast %13 : vector<1x128xf32> to vector<128x128xf32>
    %15 = arith.mulf %7, %14 : vector<128x128xf32>
    %c0_7 = arith.constant 0 : index
    %c0_8 = arith.constant 0 : index
    %16 = vector.load %arg5[%c0_7, %c0_8] : memref<128x128xf32, #tpu.memory_space<vmem>>, vector<128x128xf32>
    tpu.vector_store %arg5[%c0_7, %c0_8], %15 {strides = array<i32>} : memref<128x128xf32, #tpu.memory_space<vmem>>, vector<128x128xf32>,
    return
  }
  func.func @transform_0(%arg0: i32, %arg1: i32) -> i32 {
    %c0_i32 = arith.constant 0 : i32
    %c0_i32_0 = arith.constant 0 : i32
    return %c0_i32 : i32
  }
  func.func @transform_1(%arg0: i32, %arg1: i32) -> (i32, i32, i32) {
    %c0_i32 = arith.constant 0 : i32
    %c0_i32_0 = arith.constant 0 : i32
    return %arg1, %arg0, %c0_i32 : i32, i32, i32
  }
  func.func @transform_2(%arg0: i32, %arg1: i32) -> (i32, i32) {
    %c0_i32 = arith.constant 0 : i32
    %c0_i32_0 = arith.constant 0 : i32
    return %c0_i32, %arg0 : i32, i32
  }
  func.func @transform_3(%arg0: i32, %arg1: i32) -> (i32, i32) {
    %c0_i32 = arith.constant 0 : i32
    %c0_i32_0 = arith.constant 0 : i32
    return %c0_i32, %arg0 : i32, i32
  }
}

</mosaic_0001>

<bundles_post_ra>
// kernel: tpu_custom_call.1
= control target key start
LH: loop header
LB: loop body
LE: loop exit
PB: predicated region body
PF: predicated region fallthrough
CT: control target
= control target key end

     0   :  { %9 = vsyncpa [#allocation4], 0  ;;  %s645_s0 = inlined_call_operand.<no memory space> [shape: f32[1], index: 0, kind: input, shape index: {}]   ;;  %s646_s1 = inlined_call_operand.hbm [shape: f32[8,16,128], index: 1, kind: input, shape index: {}]   ;;  %s647_s2 = inlined_call_operand.hbm [shape: f32[128,128], index: 2, kind: input, shape index: {}]   ;;  %s648_s3 = inlined_call_operand.hbm [shape: f32[128,128], index: 3, kind: output, shape index: {}]  }
   0x1   :  { %10 = vsyncpa [#allocation7], 0 }
   0x2   :  { %11 = vsyncpa [#allocation5], 0 }
   0x3   :  { %18 = vsyncadd [#allocation4], 12544  ;;  %s23_s12 = sld [smem:[#allocation0]]   ;;  %s514_s13 = smov [#allocation3]  }
   0x4   :  { %s31_s14 = sshll.u32 %s514_s13, 4  ;;  %s515_s15 = smov 256   ;;  %s32_s14 = int_to_ptr.vmem [resolvable:$true] %s31_s14 }
   0x5   :  { %38 = sst [smem:[#allocation10]] %s515_s15  ;;  %s516_s16 = smov 2048  }
   0x6   :  { %40 = sst [smem:[#allocation10 + $0x1]] %s516_s16  ;;  %s517_s17 = smov 2  }
   0x7   :  { %42 = sst [smem:[#allocation10 + $0x2]] %s517_s17  ;;  %s518_s19 = smov 128  }
   0x8   :  { %44 = sst [smem:[#allocation10 + $0x3]] %s518_s19  ;;  %s519_s21 = smov 8  }
   0x9   :  { %s448_s18 = sshll.u32 %s23_s12, 26  ;;  %46 = sst [smem:[#allocation10 + $0x4]] %s518_s19 }
   0xa   :  { %s449_s20 = sadd.s32 134217728, %s448_s18  ;;  %48 = sst [smem:[#allocation10 + $0x5]] %s519_s21 }
   0xb   :  { %s520_s22 = smov [#allocation4]   ;;  %s521_s23 = smov [#allocation9]  }
   0xc   :  { %50 = dma.general %s646_s1, 1792, %s32_s14, %s520_s22, %s521_s23, [#allocation10], %s449_s20, 0  }
   0xd   :  { %s522_s26 = smov [#allocation6]   ;;  %s464_s30 = scalar_lea.hbm %s647_s2, 2048 }
   0xe   :  { %s56_s27 = sshll.u32 %s522_s26, 4  ;;  %p465_p0 = scmp.ne.s32.totalorder %s647_s2, %s464_s30  ;;  %s57_s27 = int_to_ptr.vmem [resolvable:$true] %s56_s27 }
   0xf   :  { %p468_p1 = scmp.lt.u32.totalorder %s464_s30, %s647_s2 }
  0x11   :  { %p470_p2 = pnand %p468_p1, %p465_p0 }
  0x13   :  { %473 = shalt.err (!%p470_p2)
}
  0x14   :  { %s474_s8 = scalar_lea.vmem %s57_s27, 2048  ;;  %p479_p4 = scmp.lt.s32.totalorder %s57_s27, %s57_s27 }
  0x15   :  { %p475_p3 = scmp.ne.s32.totalorder %s57_s27, %s474_s8  ;;  %p480_p5 = scmp.lt.s32.totalorder %s474_s8, %s474_s8 }
  0x17   :  { %p481_p6 = por %p480_p5, %p479_p4 }
  0x19   :  { %p482_p7 = pnand %p481_p6, %p475_p3 }
  0x1b   :  { %485 = shalt.err (!%p482_p7)
}
  0x1c   :  { %s523_s1 = smov 128   ;;  %s524_s9 = smov 8  }
  0x1d   :  { %62 = dma.hbm_to_vmem [thread:$0]  %s647_s2, 2048, %s57_s27, [#allocation7], %s523_s1, %s523_s1, %s524_s9  }
  0x1e   :  { %508 = dma.done.wait [#allocation4], 14336  }
  0x1f   :  { %509 = vsyncadd [#allocation4], 4294952960 }
  0x20   :  { %510 = dma.done.wait [#allocation7], 2048  }
  0x21   :  { %511 = vsyncadd [#allocation7], 4294965248  ;;  %v69_v0 = vld [vmem:[#allocation3] sm:$0xff]  ;;  %v70_v5 = vld [vmem:[#allocation3 + $0x8] sm:$0xff] }
  0x22   :  { %v85_v1 = vld [vmem:[#allocation3 + $0x80] sm:$0xff]  ;;  %v86_v6 = vld [vmem:[#allocation3 + $0x88] sm:$0xff]  ;;  %v71_v12 = vld [vmem:[#allocation3 + $0x10] sm:$0xff] }
  0x23   :  { %v101_v2 = vld [vmem:[#allocation3 + $0x100] sm:$0xff]  ;;  %v181_v3 = vadd.f32 %v85_v1, %v69_v0  ;;  %v102_v8 = vld [vmem:[#allocation3 + $0x108] sm:$0xff]  ;;  %v187_v9 = vadd.f32 %v86_v6, %v70_v5  ;;  %v87_v15 = vld [vmem:[#allocation3 + $0x90] sm:$0xff] }
  0x24   :  { %v117_v4 = vld [vmem:[#allocation3 + $0x180] sm:$0xff]  ;;  %v118_v11 = vld [vmem:[#allocation3 + $0x188] sm:$0xff]  ;;  %v103_v16 = vld [vmem:[#allocation3 + $0x110] sm:$0xff]  ;;  %v193_v20 = vadd.f32 %v87_v15, %v71_v12 }
  0x25   :  { %v182_v7 = vadd.f32 %v181_v3, %v101_v2  ;;  %v133_v10 = vld [vmem:[#allocation3 + $0x200] sm:$0xff]  ;;  %v188_v14 = vadd.f32 %v187_v9, %v102_v8  ;;  %v134_v18 = vld [vmem:[#allocation3 + $0x208] sm:$0xff]  ;;  %v119_v19 = vld [vmem:[#allocation3 + $0x190] sm:$0xff] }
  0x26   :  { %v149_v17 = vld [vmem:[#allocation3 + $0x280] sm:$0xff]  ;;  %v72_v23 = vld [vmem:[#allocation3 + $0x18] sm:$0xff]  ;;  %v150_v27 = vld [vmem:[#allocation3 + $0x288] sm:$0xff]  ;;  %v194_v29 = vadd.f32 %v193_v20, %v103_v16 }
  0x27   :  { %v183_v13 = vadd.f32 %v182_v7, %v117_v4  ;;  %v189_v22 = vadd.f32 %v188_v14, %v118_v11  ;;  %v88_v24 = vld [vmem:[#allocation3 + $0x98] sm:$0xff]  ;;  %v165_v26 = vld [vmem:[#allocation3 + $0x300] sm:$0xff]  ;;  %v135_v28 = vld [vmem:[#allocation3 + $0x210] sm:$0xff] }
  0x28   :  { %v104_v25 = vld [vmem:[#allocation3 + $0x118] sm:$0xff]  ;;  %v199_v30 = vadd.f32 %v88_v24, %v72_v23  ;;  %v73_v34 = vld [vmem:[#allocation3 + $0x20] sm:$0xff]  ;;  %v166_v36 = vld [vmem:[#allocation3 + $0x308] sm:$0xff]  ;;  %v195_v38 = vadd.f32 %v194_v29, %v119_v19 }
  0x29   :  { %v184_v21 = vadd.f32 %v183_v13, %v133_v10  ;;  %v190_v32 = vadd.f32 %v189_v22, %v134_v18  ;;  %v120_v33 = vld [vmem:[#allocation3 + $0x198] sm:$0xff]  ;;  %v89_v35 = vld [vmem:[#allocation3 + $0xa0] sm:$0xff]  ;;  %v151_v37 = vld [vmem:[#allocation3 + $0x290] sm:$0xff] }
  0x2a   :  { %v200_v39 = vadd.f32 %v199_v30, %v104_v25  ;;  %v105_v40 = vld [vmem:[#allocation3 + $0x120] sm:$0xff]  ;;  %v205_v41 = vadd.f32 %v89_v35, %v73_v34  ;;  %v136_v44 = vld [vmem:[#allocation3 + $0x218] sm:$0xff]  ;;  %v74_v46 = vld [vmem:[#allocation3 + $0x28] sm:$0xff]  ;;  %v196_v48 = vadd.f32 %v195_v38, %v135_v28 }
  0x2b   :  { %v185_v31 = vadd.f32 %v184_v21, %v149_v17  ;;  %v191_v43 = vadd.f32 %v190_v32, %v150_v27  ;;  %v121_v45 = vld [vmem:[#allocation3 + $0x1a0] sm:$0xff]  ;;  %v167_v47 = vld [vmem:[#allocation3 + $0x310] sm:$0xff]  ;;  %v90_v51 = vld [vmem:[#allocation3 + $0xa8] sm:$0xff] }
  0x2c   :  { %v201_v49 = vadd.f32 %v200_v39, %v120_v33  ;;  %v206_v50 = vadd.f32 %v205_v41, %v105_v40  ;;  %v106_v52 = vld [vmem:[#allocation3 + $0x128] sm:$0xff]  ;;  %v152_v54 = vld [vmem:[#allocation3 + $0x298] sm:$0xff]  ;;  %v137_v55 = vld [vmem:[#allocation3 + $0x220] sm:$0xff]  ;;  %v211_v57 = vadd.f32 %v90_v51, %v74_v46  ;;  %v197_v58 = vadd.f32 %v196_v48, %v151_v37 }
  0x2d   :  { %v186_v42 = vadd.f32 %v185_v31, %v165_v26  ;;  %v192_v53 = vadd.f32 %v191_v43, %v166_v36  ;;  %v122_v56 = vld [vmem:[#allocation3 + $0x1a8] sm:$0xff]  ;;  %v75_v61 = vld [vmem:[#allocation3 + $0x30] sm:$0xff]  ;;  %v76_v4 = vld [vmem:[#allocation3 + $0x38] sm:$0xff] }
  0x2e   :  { %v202_v59 = vadd.f32 %v201_v49, %v136_v44  ;;  %v207_v60 = vadd.f32 %v206_v50, %v121_v45  ;;  %v91_v62 = vld [vmem:[#allocation3 + $0xb0] sm:$0xff]  ;;  %v212_v0 = vadd.f32 %v211_v57, %v106_v52  ;;  %v198_v2 = vadd.f32 %v197_v58, %v167_v47  ;;  %v92_v5 = vld [vmem:[#allocation3 + $0xb8] sm:$0xff]  ;;  %v153_v8 = vld [vmem:[#allocation3 + $0x2a0] sm:$0xff] }
  0x2f   :  { %277 = vxpose.xlu0.b32.start [1/16] %v186_v42, 128  ;;  %v107_v63 = vld [vmem:[#allocation3 + $0x130] sm:$0xff]  ;;  %v217_v1 = vadd.f32 %v91_v62, %v75_v61  ;;  %v168_v6 = vld [vmem:[#allocation3 + $0x318] sm:$0xff]  ;;  %v138_v9 = vld [vmem:[#allocation3 + $0x228] sm:$0xff]  ;;  %v223_v12 = vadd.f32 %v92_v5, %v76_v4 }
  0x30   :  { %v208_v3 = vadd.f32 %v207_v60, %v137_v55  ;;  %v203_v7 = vadd.f32 %v202_v59, %v152_v54  ;;  %v213_v10 = vadd.f32 %v212_v0, %v122_v56  ;;  %v123_v13 = vld [vmem:[#allocation3 + $0x1b0] sm:$0xff]  ;;  %v108_v14 = vld [vmem:[#allocation3 + $0x138] sm:$0xff]  ;;  %v77_v15 = vld [vmem:[#allocation3 + $0x40] sm:$0xff] }
  0x31   :  { %v218_v11 = vadd.f32 %v217_v1, %v107_v63  ;;  %v93_v16 = vld [vmem:[#allocation3 + $0xc0] sm:$0xff]  ;;  %v154_v21 = vld [vmem:[#allocation3 + $0x2a8] sm:$0xff]  ;;  %v139_v22 = vld [vmem:[#allocation3 + $0x230] sm:$0xff]  ;;  %v224_v25 = vadd.f32 %v223_v12, %v108_v14 }
  0x32   :  { %v169_v17 = vld [vmem:[#allocation3 + $0x320] sm:$0xff]  ;;  %v209_v18 = vadd.f32 %v208_v3, %v153_v8  ;;  %v214_v19 = vadd.f32 %v213_v10, %v138_v9  ;;  %v204_v20 = vadd.f32 %v203_v7, %v168_v6  ;;  %v124_v24 = vld [vmem:[#allocation3 + $0x1b8] sm:$0xff]  ;;  %v229_v26 = vadd.f32 %v93_v16, %v77_v15  ;;  %v78_v28 = vld [vmem:[#allocation3 + $0x48] sm:$0xff] }
  0x33   :  { %278 = vxpose.xlu0.b32.cont [2/16] %v192_v53, 128  ;;  %v219_v23 = vadd.f32 %v218_v11, %v123_v13  ;;  %v109_v27 = vld [vmem:[#allocation3 + $0x140] sm:$0xff]  ;;  %v94_v29 = vld [vmem:[#allocation3 + $0xc8] sm:$0xff]  ;;  %v155_v33 = vld [vmem:[#allocation3 + $0x2b0] sm:$0xff]  ;;  %v225_v35 = vadd.f32 %v224_v25, %v124_v24 }
  0x34   :  { %v210_v30 = vadd.f32 %v209_v18, %v169_v17  ;;  %v170_v31 = vld [vmem:[#allocation3 + $0x328] sm:$0xff]  ;;  %v215_v32 = vadd.f32 %v214_v19, %v154_v21  ;;  %v230_v36 = vadd.f32 %v229_v26, %v109_v27  ;;  %v235_v37 = vadd.f32 %v94_v29, %v78_v28  ;;  %v79_v38 = vld [vmem:[#allocation3 + $0x50] sm:$0xff]  ;;  %v140_v40 = vld [vmem:[#allocation3 + $0x238] sm:$0xff] }
  0x35   :  { %v220_v34 = vadd.f32 %v219_v23, %v139_v22  ;;  %v95_v39 = vld [vmem:[#allocation3 + $0xd0] sm:$0xff]  ;;  %v125_v41 = vld [vmem:[#allocation3 + $0x1c0] sm:$0xff]  ;;  %v110_v42 = vld [vmem:[#allocation3 + $0x148] sm:$0xff]  ;;  %v226_v47 = vadd.f32 %v225_v35, %v140_v40 }
  0x36   :  { %v216_v43 = vadd.f32 %v215_v32, %v170_v31  ;;  %v171_v44 = vld [vmem:[#allocation3 + $0x330] sm:$0xff]  ;;  %v241_v45 = vadd.f32 %v95_v39, %v79_v38  ;;  %v231_v48 = vadd.f32 %v230_v36, %v125_v41  ;;  %v236_v49 = vadd.f32 %v235_v37, %v110_v42  ;;  %v80_v51 = vld [vmem:[#allocation3 + $0x58] sm:$0xff]  ;;  %v141_v54 = vld [vmem:[#allocation3 + $0x240] sm:$0xff] }
  0x37   :  { %279 = vxpose.xlu0.b32.cont [3/16] %v198_v2, 128  ;;  %v221_v46 = vadd.f32 %v220_v34, %v155_v33  ;;  %v111_v50 = vld [vmem:[#allocation3 + $0x150] sm:$0xff]  ;;  %v96_v52 = vld [vmem:[#allocation3 + $0xd8] sm:$0xff]  ;;  %v126_v55 = vld [vmem:[#allocation3 + $0x1c8] sm:$0xff] }
  0x38   :  { %v156_v53 = vld [vmem:[#allocation3 + $0x2b8] sm:$0xff]  ;;  %v242_v57 = vadd.f32 %v241_v45, %v111_v50  ;;  %v247_v58 = vadd.f32 %v96_v52, %v80_v51  ;;  %v157_v61 = vld [vmem:[#allocation3 + $0x2c0] sm:$0xff]  ;;  %v232_v62 = vadd.f32 %v231_v48, %v141_v54  ;;  %v237_v63 = vadd.f32 %v236_v49, %v126_v55  ;;  %v127_v0 = vld [vmem:[#allocation3 + $0x1d0] sm:$0xff] }
  0x39   :  { %v172_v56 = vld [vmem:[#allocation3 + $0x338] sm:$0xff]  ;;  %v222_v59 = vadd.f32 %v221_v46, %v171_v44  ;;  %v227_v60 = vadd.f32 %v226_v47, %v156_v53  ;;  %v142_v2 = vld [vmem:[#allocation3 + $0x248] sm:$0xff]  ;;  %v81_v3 = vld [vmem:[#allocation3 + $0x60] sm:$0xff] }
  0x3a   :  { %v112_v1 = vld [vmem:[#allocation3 + $0x158] sm:$0xff]  ;;  %v97_v4 = vld [vmem:[#allocation3 + $0xe0] sm:$0xff]  ;;  %v243_v6 = vadd.f32 %v242_v57, %v127_v0  ;;  %v233_v9 = vadd.f32 %v232_v62, %v157_v61  ;;  %v158_v10 = vld [vmem:[#allocation3 + $0x2c8] sm:$0xff]  ;;  %v238_v11 = vadd.f32 %v237_v63, %v142_v2 }
  0x3b   :  { %280 = vxpose.xlu0.b32.cont [4/16] %v204_v20, 128  ;;  %v173_v5 = vld [vmem:[#allocation3 + $0x340] sm:$0xff]  ;;  %v248_v7 = vadd.f32 %v247_v58, %v112_v1  ;;  %v228_v8 = vadd.f32 %v227_v60, %v172_v56  ;;  %v143_v12 = vld [vmem:[#allocation3 + $0x250] sm:$0xff]  ;;  %v128_v13 = vld [vmem:[#allocation3 + $0x1d8] sm:$0xff]  ;;  %v253_v14 = vadd.f32 %v97_v4, %v81_v3 }
  0x3c   :  { %v113_v15 = vld [vmem:[#allocation3 + $0x160] sm:$0xff]  ;;  %v82_v16 = vld [vmem:[#allocation3 + $0x68] sm:$0xff]  ;;  %v244_v19 = vadd.f32 %v243_v6, %v143_v12  ;;  %v234_v21 = vadd.f32 %v233_v9, %v173_v5  ;;  %v239_v22 = vadd.f32 %v238_v11, %v158_v10  ;;  %v159_v23 = vld [vmem:[#allocation3 + $0x2d0] sm:$0xff] }
  0x3d   :  { %v98_v17 = vld [vmem:[#allocation3 + $0xe8] sm:$0xff]  ;;  %v249_v20 = vadd.f32 %v248_v7, %v128_v13  ;;  %v144_v24 = vld [vmem:[#allocation3 + $0x258] sm:$0xff]  ;;  %v129_v25 = vld [vmem:[#allocation3 + $0x1e0] sm:$0xff]  ;;  %v254_v26 = vadd.f32 %v253_v14, %v113_v15 }
  0x3e   :  { %v174_v18 = vld [vmem:[#allocation3 + $0x348] sm:$0xff]  ;;  %v259_v27 = vadd.f32 %v98_v17, %v82_v16  ;;  %v83_v29 = vld [vmem:[#allocation3 + $0x70] sm:$0xff]  ;;  %v245_v32 = vadd.f32 %v244_v19, %v159_v23  ;;  %v160_v35 = vld [vmem:[#allocation3 + $0x2d8] sm:$0xff]  ;;  %v567_v23 = vstv %s645_s0  ;;  %s525_s0 = smov [#allocation8]  }
  0x3f   :  { %281 = vxpose.xlu0.b32.cont [5/16] %v210_v30, 128  ;;  %v114_v28 = vld [vmem:[#allocation3 + $0x168] sm:$0xff]  ;;  %v99_v30 = vld [vmem:[#allocation3 + $0xf0] sm:$0xff]  ;;  %v250_v33 = vadd.f32 %v249_v20, %v144_v24  ;;  %v240_v34 = vadd.f32 %v239_v22, %v174_v18  ;;  %v145_v36 = vld [vmem:[#allocation3 + $0x260] sm:$0xff]  ;;  %v255_v37 = vadd.f32 %v254_v26, %v129_v25  ;;  %s435_s13 = sshll.u32 %s525_s0, 4  ;;  %s436_s13 = int_to_ptr.vmem [resolvable:$true] %s435_s13 }
  0x40   :  { %v175_v31 = vld [vmem:[#allocation3 + $0x350] sm:$0xff]  ;;  %v130_v38 = vld [vmem:[#allocation3 + $0x1e8] sm:$0xff]  ;;  %v260_v39 = vadd.f32 %v259_v27, %v114_v28  ;;  %v265_v40 = vadd.f32 %v99_v30, %v83_v29  ;;  %v84_v42 = vld [vmem:[#allocation3 + $0x78] sm:$0xff]  ;;  %s486_s14 = scalar_lea.vmem %s436_s13, 2048  ;;  %p491_p9 = scmp.lt.s32.totalorder %s436_s13, %s436_s13 }
  0x41   :  { %v115_v41 = vld [vmem:[#allocation3 + $0x170] sm:$0xff]  ;;  %v246_v44 = vadd.f32 %v245_v32, %v175_v31  ;;  %v251_v45 = vadd.f32 %v250_v33, %v160_v35  ;;  %v176_v46 = vld [vmem:[#allocation3 + $0x358] sm:$0xff]  ;;  %v161_v47 = vld [vmem:[#allocation3 + $0x2e0] sm:$0xff]  ;;  %v256_v48 = vadd.f32 %v255_v37, %v145_v36  ;;  %p487_p8 = scmp.ne.s32.totalorder %s436_s13, %s486_s14  ;;  %p492_p10 = scmp.lt.s32.totalorder %s486_s14, %s486_s14 }
  0x42   :  { %v261_v49 = vadd.f32 %v260_v39, %v130_v38  ;;  %v266_v50 = vadd.f32 %v265_v40, %v115_v41  ;;  %v146_v52 = vld [vmem:[#allocation3 + $0x268] sm:$0xff]  ;;  %v131_v53 = vld [vmem:[#allocation3 + $0x1f0] sm:$0xff]  ;;  %v116_v54 = vld [vmem:[#allocation3 + $0x178] sm:$0xff] }
  0x43   :  { %282 = vxpose.xlu0.b32.cont [6/16] %v216_v43, 128  ;;  %v100_v43 = vld [vmem:[#allocation3 + $0xf8] sm:$0xff]  ;;  %v252_v55 = vadd.f32 %v251_v45, %v176_v46  ;;  %v177_v56 = vld [vmem:[#allocation3 + $0x360] sm:$0xff]  ;;  %v257_v57 = vadd.f32 %v256_v48, %v161_v47  ;;  %v162_v61 = vld [vmem:[#allocation3 + $0x2e8] sm:$0xff]  ;;  %p493_p11 = por %p492_p10, %p491_p9 }
  0x44   :  { %v271_v51 = vadd.f32 %v100_v43, %v84_v42  ;;  %v262_v58 = vadd.f32 %v261_v49, %v146_v52  ;;  %v147_v62 = vld [vmem:[#allocation3 + $0x270] sm:$0xff]  ;;  %v132_v63 = vld [vmem:[#allocation3 + $0x1f8] sm:$0xff]  ;;  %v178_v4 = vld [vmem:[#allocation3 + $0x368] sm:$0xff] }
  0x45   :  { %v258_v0 = vadd.f32 %v257_v57, %v177_v56  ;;  %v163_v5 = vld [vmem:[#allocation3 + $0x2f0] sm:$0xff]  ;;  %v148_v6 = vld [vmem:[#allocation3 + $0x278] sm:$0xff]  ;;  %v328_v25 = vld [vmem:[#allocation6 + $0x8] sm:$0xff]  ;;  %p494_p12 = pnand %p493_p11, %p487_p8 }
  0x46   :  { %v272_v60 = vadd.f32 %v271_v51, %v116_v54  ;;  %v263_v1 = vadd.f32 %v262_v58, %v162_v61  ;;  %v179_v10 = vld [vmem:[#allocation3 + $0x370] sm:$0xff]  ;;  %v164_v11 = vld [vmem:[#allocation3 + $0x2f8] sm:$0xff]  ;;  %v327_v29 = vld [vmem:[#allocation6] sm:$0xff] }
  0x47   :  { %283 = vxpose.xlu0.b32.cont [7/16] %v222_v59, 128  ;;  %v267_v59 = vadd.f32 %v266_v50, %v131_v53  ;;  %v180_v14 = vld [vmem:[#allocation3 + $0x378] sm:$0xff]  ;;  %v329_v30 = vld [vmem:[#allocation6 + $0x10] sm:$0xff]  ;;  %v331_v38 = vld [vmem:[#allocation6 + $0x20] sm:$0xff] }
  0x48   :  { %v273_v3 = vadd.f32 %v272_v60, %v132_v63  ;;  %v264_v7 = vadd.f32 %v263_v1, %v178_v4  ;;  %v330_v33 = vld [vmem:[#allocation6 + $0x18] sm:$0xff]  ;;  %v332_v42 = vld [vmem:[#allocation6 + $0x28] sm:$0xff]  ;;  %v333_v48 = vld [vmem:[#allocation6 + $0x30] sm:$0xff] }
  0x49   :  { %v268_v2 = vadd.f32 %v267_v59, %v147_v62  ;;  %v334_v53 = vld [vmem:[#allocation6 + $0x38] sm:$0xff]  ;;  %v335_v59 = vld [vmem:[#allocation6 + $0x40] sm:$0xff] }
  0x4a   :  { %v274_v9 = vadd.f32 %v273_v3, %v148_v6  ;;  %v337_v6 = vld [vmem:[#allocation6 + $0x50] sm:$0xff] }
  0x4b   :  { %284 = vxpose.xlu0.b32.cont [8/16] %v228_v8, 128  ;;  %v269_v8 = vadd.f32 %v268_v2, %v163_v5 }
  0x4c   :  { %v275_v13 = vadd.f32 %v274_v9, %v164_v11  ;;  %v338_v11 = vld [vmem:[#allocation6 + $0x58] sm:$0xff] }
  0x4d   :  { %v270_v12 = vadd.f32 %v269_v8, %v179_v10 }
  0x4e   :  { %v276_v15 = vadd.f32 %v275_v13, %v180_v14 }
  0x4f   :  { %285 = vxpose.xlu0.b32.cont [9/16] %v234_v21, 128 }
  0x53   :  { %286 = vxpose.xlu0.b32.cont [10/16] %v240_v34, 128 }
  0x57   :  { %287 = vxpose.xlu0.b32.cont [11/16] %v246_v44, 128 }
  0x5b   :  { %288 = vxpose.xlu0.b32.cont [12/16] %v252_v55, 128 }
  0x5f   :  { %289 = vxpose.xlu0.b32.cont [13/16] %v258_v0, 128  ;;  %v336_v0 = vld [vmem:[#allocation6 + $0x48] sm:$0xff] }
  0x63   :  { %290 = vxpose.xlu0.b32.cont [14/16] %v264_v7, 128 }
  0x67   :  { %291 = vxpose.xlu0.b32.cont [15/16] %v270_v12, 128 }
  0x6b   :  { %292 = vxpose.xlu0.b32.end [16/16] %v276_v15, 128 }
  0xaf   :  { %v293_v16 = vpop.trf.xlu0 }
  0xb0   :  { %v311_v27 = vmul.f32 %v567_v23, %v293_v16 }
  0xb2   :  { %v575_v35 = vadd.f32 %v327_v29, %v311_v27 }
  0xb3   :  { %v294_v17 = vpop.trf.xlu0 }
  0xb4   :  { %v312_v24 = vmul.f32 %v567_v23, %v294_v17  ;;  %v359_v44 = vmul.f32 %v575_v35, %v575_v35  ;;  %v339_v17 = vld [vmem:[#allocation6 + $0x60] sm:$0xff] }
  0xb6   :  { %v572_v31 = vadd.f32 %v328_v25, %v312_v24 }
  0xb7   :  { %v295_v18 = vpop.trf.xlu0 }
  0xb8   :  { %v313_v28 = vmul.f32 %v567_v23, %v295_v18  ;;  %v360_v39 = vmul.f32 %v572_v31, %v572_v31 }
  0xba   :  { %v577_v36 = vadd.f32 %v329_v30, %v313_v28  ;;  %v375_v49 = vadd.f32 %v360_v39, %v359_v44  ;;  %v342_v44 = vld [vmem:[#allocation6 + $0x78] sm:$0xff] }
  0xbb   :  { %v296_v19 = vpop.trf.xlu0 }
  0xbc   :  { %v314_v32 = vmul.f32 %v567_v23, %v296_v19  ;;  %v361_v45 = vmul.f32 %v577_v36, %v577_v36 }
  0xbe   :  { %v582_v40 = vadd.f32 %v330_v33, %v314_v32  ;;  %v376_v55 = vadd.f32 %v375_v49, %v361_v45  ;;  %v341_v33 = vld [vmem:[#allocation6 + $0x70] sm:$0xff] }
  0xbf   :  { %v297_v20 = vpop.trf.xlu0 }
  0xc0   :  { %v315_v37 = vmul.f32 %v567_v23, %v297_v20  ;;  %v362_v50 = vmul.f32 %v582_v40, %v582_v40 }
  0xc2   :  { %v589_v46 = vadd.f32 %v331_v38, %v315_v37  ;;  %v377_v60 = vadd.f32 %v376_v55, %v362_v50 }
  0xc3   :  { %v298_v21 = vpop.trf.xlu0 }
  0xc4   :  { %v316_v41 = vmul.f32 %v567_v23, %v298_v21  ;;  %v363_v56 = vmul.f32 %v589_v46, %v589_v46 }
  0xc6   :  { %v594_v51 = vadd.f32 %v332_v42, %v316_v41  ;;  %v378_v2 = vadd.f32 %v377_v60, %v363_v56 }
  0xc7   :  { %v299_v22 = vpop.trf.xlu0 }
  0xc8   :  { %v317_v47 = vmul.f32 %v567_v23, %v299_v22  ;;  %v364_v61 = vmul.f32 %v594_v51, %v594_v51  ;;  %v340_v22 = vld [vmem:[#allocation6 + $0x68] sm:$0xff] }
  0xca   :  { %v599_v57 = vadd.f32 %v333_v48, %v317_v47  ;;  %v379_v7 = vadd.f32 %v378_v2, %v364_v61 }
  0xcb   :  { %v300_v26 = vpop.trf.xlu0 }
  0xcc   :  { %v318_v52 = vmul.f32 %v567_v23, %v300_v26  ;;  %v365_v3 = vmul.f32 %v599_v57, %v599_v57 }
  0xce   :  { %v604_v62 = vadd.f32 %v334_v53, %v318_v52  ;;  %v380_v13 = vadd.f32 %v379_v7, %v365_v3 }
  0xcf   :  { %v301_v34 = vpop.trf.xlu0 }
  0xd0   :  { %v319_v58 = vmul.f32 %v567_v23, %v301_v34  ;;  %v366_v8 = vmul.f32 %v604_v62, %v604_v62 }
  0xd2   :  { %v609_v4 = vadd.f32 %v335_v59, %v319_v58  ;;  %v381_v18 = vadd.f32 %v380_v13, %v366_v8 }
  0xd3   :  { %v302_v43 = vpop.trf.xlu0 }
  0xd4   :  { %v320_v63 = vmul.f32 %v567_v23, %v302_v43  ;;  %v367_v14 = vmul.f32 %v609_v4, %v609_v4 }
  0xd6   :  { %v352_v9 = vadd.f32 %v336_v0, %v320_v63  ;;  %v382_v24 = vadd.f32 %v381_v18, %v367_v14 }
  0xd7   :  { %v303_v54 = vpop.trf.xlu0 }
  0xd8   :  { %v321_v5 = vmul.f32 %v567_v23, %v303_v54  ;;  %v368_v19 = vmul.f32 %v352_v9, %v352_v9 }
  0xda   :  { %v353_v15 = vadd.f32 %v337_v6, %v321_v5  ;;  %v383_v28 = vadd.f32 %v382_v24, %v368_v19 }
  0xdb   :  { %v304_v1 = vpop.trf.xlu0 }
  0xdc   :  { %v322_v10 = vmul.f32 %v567_v23, %v304_v1  ;;  %v369_v25 = vmul.f32 %v353_v15, %v353_v15 }
  0xde   :  { %v354_v20 = vadd.f32 %v338_v11, %v322_v10  ;;  %v384_v34 = vadd.f32 %v383_v28, %v369_v25 }
  0xdf   :  { %v305_v12 = vpop.trf.xlu0 }
  0xe0   :  { %v323_v16 = vmul.f32 %v567_v23, %v305_v12  ;;  %v370_v29 = vmul.f32 %v354_v20, %v354_v20 }
  0xe2   :  { %v355_v26 = vadd.f32 %v339_v17, %v323_v16  ;;  %v385_v39 = vadd.f32 %v384_v34, %v370_v29 }
  0xe3   :  { %v306_v21 = vpop.trf.xlu0 }
  0xe4   :  { %v324_v27 = vmul.f32 %v567_v23, %v306_v21  ;;  %v371_v37 = vmul.f32 %v355_v26, %v355_v26 }
  0xe6   :  { %v356_v30 = vadd.f32 %v340_v22, %v324_v27  ;;  %v386_v45 = vadd.f32 %v385_v39, %v371_v37 }
  0xe7   :  { %v307_v32 = vpop.trf.xlu0 }
  0xe8   :  { %v325_v38 = vmul.f32 %v567_v23, %v307_v32  ;;  %v372_v41 = vmul.f32 %v356_v30, %v356_v30 }
  0xea   :  { %v357_v42 = vadd.f32 %v341_v33, %v325_v38  ;;  %v387_v49 = vadd.f32 %v386_v45, %v372_v41 }
  0xeb   :  { %v308_v43 = vpop.trf.xlu0 }
  0xec   :  { %v373_v47 = vmul.f32 %v357_v42, %v357_v42  ;;  %v326_v48 = vmul.f32 %v567_v23, %v308_v43 }
  0xee   :  { %v358_v50 = vadd.f32 %v342_v44, %v326_v48  ;;  %v388_v52 = vadd.f32 %v387_v49, %v373_v47 }
  0xf0   :  { %v374_v53 = vmul.f32 %v358_v50, %v358_v50 }
  0xf2   :  { %v389_v54 = vadd.f32 %v388_v52, %v374_v53 }
  0xf4   :  { %v390_v55 = vrot.slane %v389_v54, 4 }
  0xf6   :  { %v391_v56 = vadd.f32 %v390_v55, %v389_v54 }
  0xf8   :  { %v392_v58 = vrot.slane %v391_v56, 2 }
  0xfa   :  { %v393_v59 = vadd.f32 %v392_v58, %v391_v56 }
  0xfc   :  { %v394_v60 = vrot.slane %v393_v59, 1 }
  0xfe   :  { %v395_v61 = vadd.f32 %v394_v60, %v393_v59 }
 0x100   :  { %v396_v63 = vmax.f32 %v395_v61, 1e-30 }
 0x102   :  { %462 = vrsqrt.f32 %v396_v63 }
 0x10c   :  { %v463_v0 = vpop.eup %462 }
 0x10d   :  { %v413_v1 = vmul.f32 %v463_v0, %v358_v50  ;;  %v398_v2 = vmul.f32 %v463_v0, %v575_v35  ;;  %v399_v3 = vmul.f32 %v463_v0, %v572_v31  ;;  %v400_v23 = vmul.f32 %v463_v0, %v577_v36 }
 0x10e   :  { %v401_v5 = vmul.f32 %v463_v0, %v582_v40  ;;  %v402_v6 = vmul.f32 %v463_v0, %v589_v46  ;;  %v403_v7 = vmul.f32 %v463_v0, %v594_v51  ;;  %v404_v8 = vmul.f32 %v463_v0, %v599_v57 }
 0x10f   :  { %429 = vst [vmem:[#allocation8 + $0x78] sm:$0xff] %v413_v1  ;;  %v405_v10 = vmul.f32 %v463_v0, %v604_v62  ;;  %v406_v11 = vmul.f32 %v463_v0, %v609_v4  ;;  %v407_v35 = vmul.f32 %v463_v0, %v352_v9  ;;  %v408_v12 = vmul.f32 %v463_v0, %v353_v15 }
 0x110   :  { %414 = vst [vmem:[#allocation8] sm:$0xff] %v398_v2  ;;  %415 = vst [vmem:[#allocation8 + $0x8] sm:$0xff] %v399_v3  ;;  %v409_v31 = vmul.f32 %v463_v0, %v354_v20  ;;  %v410_v36 = vmul.f32 %v463_v0, %v355_v26  ;;  %v411_v13 = vmul.f32 %v463_v0, %v356_v30 }
 0x111   :  { %416 = vst [vmem:[#allocation8 + $0x10] sm:$0xff] %v400_v23  ;;  %v412_v40 = vmul.f32 %v463_v0, %v357_v42  ;;  %417 = vst [vmem:[#allocation8 + $0x18] sm:$0xff] %v401_v5 }
 0x112   :  { %418 = vst [vmem:[#allocation8 + $0x20] sm:$0xff] %v402_v6  ;;  %419 = vst [vmem:[#allocation8 + $0x28] sm:$0xff] %v403_v7 }
 0x113   :  { %420 = vst [vmem:[#allocation8 + $0x30] sm:$0xff] %v404_v8  ;;  %421 = vst [vmem:[#allocation8 + $0x38] sm:$0xff] %v405_v10 }
 0x114   :  { %422 = vst [vmem:[#allocation8 + $0x40] sm:$0xff] %v406_v11  ;;  %423 = vst [vmem:[#allocation8 + $0x48] sm:$0xff] %v407_v35 }
 0x115   :  { %424 = vst [vmem:[#allocation8 + $0x50] sm:$0xff] %v408_v12  ;;  %425 = vst [vmem:[#allocation8 + $0x58] sm:$0xff] %v409_v31 }
 0x116   :  { %426 = vst [vmem:[#allocation8 + $0x60] sm:$0xff] %v410_v36  ;;  %427 = vst [vmem:[#allocation8 + $0x68] sm:$0xff] %v411_v13 }
 0x117   :  { %428 = vst [vmem:[#allocation8 + $0x70] sm:$0xff] %v412_v40 }
 0x118   :  { %497 = shalt.err (!%p494_p12)
}
 0x119   :  { %s498_s17 = scalar_lea.hbm %s648_s3, 2048 }
 0x11a   :  { %p499_p13 = scmp.ne.s32.totalorder %s648_s3, %s498_s17  ;;  %p502_p0 = scmp.lt.u32.totalorder %s498_s17, %s648_s3 }
 0x11c   :  { %p504_p1 = pnand %p502_p0, %p499_p13 }
 0x11e   :  { %507 = shalt.err (!%p504_p1)
}
 0x11f   :  { %441 = dma.vmem_to_hbm [thread:$0]  %s436_s13, 2048, %s648_s3, [#allocation5], %s523_s1, %s523_s1, %s524_s9  }
 0x120   :  { %512 = dma.done.wait [#allocation5], 2048  }
 0x121   :  { %513 = vsyncadd [#allocation5], 4294965248 }
 0x122   :  { %445 = vsyncpa [#allocation4], 1 }
 0x123   :  { %446 = vsyncpa [#allocation7], 1 }
 0x124   :  { %447 = vsyncpa [#allocation5], 1 }

</bundles_post_ra>
